<compile_context>
chip_gen: v7x
topology: tpu7x:2x2x1
jax: 0.10.0
libtpu: 0.0.40
codegen_flags: <defaults>
</compile_context>

<pallas_src>
import functools

import jax
import jax.numpy as jnp
from jax.experimental import pallas as pl
from jax.experimental.pallas import tpu as pltpu


_DEFAULT_BLOCK_BUDGET_BYTES = 4 * 1024 * 1024  # per x block; with double-buffered
                                               # in+out that is ~16 MiB of VMEM,
                                               # safe on v5e/v6e (128 MiB) and v7x (64 MiB).
_VMEM_LIMIT_BYTES = 48 * 1024 * 1024


# ---------------------------------------------------------------------------
# Trace-time tile selection helpers
# ---------------------------------------------------------------------------
def _pick_tile(n, cap):
    """Largest divisor of n that is <= cap (at least 1)."""
    cap = max(1, min(n, cap))
    for t in range(cap, 0, -1):
        if n % t == 0:
            return t
    return 1


def _pick_seq_tile(s, cap, sublane_multiple):
    """Largest divisor of s that is a multiple of sublane_multiple and <= cap
    (floored at one sublane group); falls back to the full axis (always legal)."""
    m = sublane_multiple
    if s % m != 0:
        return s                      # full-extent block is always allowed
    if s <= cap:
        return s
    t = max(m, (cap // m) * m)
    while t >= m:
        if s % t == 0:
            return t
        t -= m
    return s


def _choose_tiles(e, num_heads, seq, dim, itemsize, budget, leading_factor=1):
    """Pick (tile_e, tile_s) so the x block roughly fits `budget` bytes.

    leading_factor accounts for an extra leading block axis (rank, gamma path)."""
    bytes_full_seq = leading_factor * num_heads * seq * dim * itemsize
    if bytes_full_seq <= budget:
        return _pick_tile(e, budget // bytes_full_seq), seq
    sublane_multiple = 8 if itemsize >= 4 else 16
    row_bytes = leading_factor * num_heads * dim * itemsize
    tile_s = _pick_seq_tile(seq, max(1, budget // row_bytes), sublane_multiple)
    return 1, tile_s


# ---------------------------------------------------------------------------
# Kernels
# ---------------------------------------------------------------------------
def _mul_rank1_kernel(x_ref, w_ref, o_ref):
    # x_ref/o_ref: (TILE_E, H, TILE_S, D); w_ref: (H, 1, D) (VMEM-resident).
    o_ref[...] = x_ref[...] * w_ref[...][None]


def _alpha_rank_gt1_kernel(x_ref, w_ref, o_ref):
    # x_ref: (TILE_E, H, TILE_S, D); w_ref: (rank, H, 1, D);
    # o_ref: (1, TILE_E, H, TILE_S, D).  rank is the innermost grid axis, so the
    # x block stays resident across it; select the weight row in-kernel.
    r = pl.program_id(2)
    o_ref[0] = x_ref[...] * w_ref[pl.ds(r, 1)]


def _gamma_rank_gt1_kernel(x_ref, w_ref, o_ref, *, rank):
    # x_ref: (rank, TILE_E, H, TILE_S, D); w_ref: (rank, H, 1, D);
    # o_ref: (TILE_E, H, TILE_S, D).  Whole rank-mean in one grid step,
    # accumulated in f32 (rank is small and static -> unrolled).
    acc = x_ref[0].astype(jnp.float32) * w_ref[0].astype(jnp.float32)
    for r in range(1, rank):
        acc = acc + x_ref[r].astype(jnp.float32) * w_ref[r].astype(jnp.float32)
    o_ref[...] = (acc * (1.0 / rank)).astype(o_ref.dtype)


# ---------------------------------------------------------------------------
# Pallas wrappers
# ---------------------------------------------------------------------------
def _alpha_like_rank1(x, weight, num_heads, block_budget_bytes):
    # out[b, s, d] = x[b, s, d] * weight[b % num_heads, d]
    B, S, D = x.shape
    assert B % num_heads == 0 and B // num_heads > 0
    e = B // num_heads
    itemsize = jnp.dtype(x.dtype).itemsize
    tile_e, tile_s = _choose_tiles(e, num_heads, S, D, itemsize, block_budget_bytes)

    x4 = x.reshape(e, num_heads, S, D)          # free view: b = e_idx * H + h
    w3 = weight.reshape(num_heads, 1, D)

    out = pl.pallas_call(
        _mul_rank1_kernel,
        out_shape=jax.ShapeDtypeStruct((e, num_heads, S, D), x.dtype),
        grid_spec=pltpu.PrefetchScalarGridSpec(
            num_scalar_prefetch=0,
            grid=(e // tile_e, S // tile_s),
            in_specs=[
                pl.BlockSpec((tile_e, num_heads, tile_s, D),
                             lambda i, k: (i, 0, k, 0)),
                pl.BlockSpec((num_heads, 1, D), lambda i, k: (0, 0, 0)),
            ],
            out_specs=pl.BlockSpec((tile_e, num_heads, tile_s, D),
                                   lambda i, k: (i, 0, k, 0)),
        ),
        compiler_params=pltpu.CompilerParams(
            dimension_semantics=("parallel", "parallel"),
            vmem_limit_bytes=_VMEM_LIMIT_BYTES,
        ),
    )(x4, w3)
    return out.reshape(B, S, D)


def _alpha_rank_gt1(x, weight, num_heads, block_budget_bytes):
    # out[r*B + b, s, d] = x[b, s, d] * weight[r, b % num_heads, d]
    B, S, D = x.shape
    rank = weight.shape[0]
    assert B % num_heads == 0 and B // num_heads > 0
    e = B // num_heads
    itemsize = jnp.dtype(x.dtype).itemsize
    tile_e, tile_s = _choose_tiles(e, num_heads, S, D, itemsize, block_budget_bytes)

    x4 = x.reshape(e, num_heads, S, D)
    w4 = weight.reshape(rank, num_heads, 1, D)

    out5 = pl.pallas_call(
        _alpha_rank_gt1_kernel,
        out_shape=jax.ShapeDtypeStruct((rank, e, num_heads, S, D), x.dtype),
        grid_spec=pltpu.PrefetchScalarGridSpec(
            num_scalar_prefetch=0,
            grid=(e // tile_e, S // tile_s, rank),   # rank innermost -> x resident
            in_specs=[
                pl.BlockSpec((tile_e, num_heads, tile_s, D),
                             lambda i, k, r: (i, 0, k, 0)),
                pl.BlockSpec((rank, num_heads, 1, D),
                             lambda i, k, r: (0, 0, 0, 0)),
            ],
            out_specs=pl.BlockSpec((1, tile_e, num_heads, tile_s, D),
                                   lambda i, k, r: (r, i, 0, k, 0)),
        ),
        compiler_params=pltpu.CompilerParams(
            dimension_semantics=("parallel", "parallel", "arbitrary"),
            vmem_limit_bytes=_VMEM_LIMIT_BYTES,
        ),
    )(x4, w4)
    return out5.reshape(rank * B, S, D)


def _gamma_rank_gt1(x, weight, num_heads, block_budget_bytes):
    # x viewed as (rank, B_out, S, D); out[i] = mean_r weight[r, i % num_heads] * x[r, i]
    B, S, D = x.shape
    rank = weight.shape[0]
    assert B % rank == 0
    B_out = B // rank
    assert B_out % num_heads == 0 and B_out // num_heads > 0
    e = B_out // num_heads
    itemsize = jnp.dtype(x.dtype).itemsize
    tile_e, tile_s = _choose_tiles(e, num_heads, S, D, itemsize,
                                   block_budget_bytes, leading_factor=rank)

    x5 = x.reshape(rank, e, num_heads, S, D)    # free view
    w4 = weight.reshape(rank, num_heads, 1, D)

    out4 = pl.pallas_call(
        functools.partial(_gamma_rank_gt1_kernel, rank=rank),
        out_shape=jax.ShapeDtypeStruct((e, num_heads, S, D), x.dtype),
        grid_spec=pltpu.PrefetchScalarGridSpec(
            num_scalar_prefetch=0,
            grid=(e // tile_e, S // tile_s),
            in_specs=[
                pl.BlockSpec((rank, tile_e, num_heads, tile_s, D),
                             lambda i, k: (0, i, 0, k, 0)),
                pl.BlockSpec((rank, num_heads, 1, D), lambda i, k: (0, 0, 0, 0)),
            ],
            out_specs=pl.BlockSpec((tile_e, num_heads, tile_s, D),
                                   lambda i, k: (i, 0, k, 0)),
        ),
        compiler_params=pltpu.CompilerParams(
            dimension_semantics=("parallel", "parallel"),
            vmem_limit_bytes=_VMEM_LIMIT_BYTES,
        ),
    )(x5, w4)
    return out4.reshape(B_out, S, D)


# ---------------------------------------------------------------------------
# Module equivalent
# ---------------------------------------------------------------------------
class ElementWiseMultiply:
    """JAX/Pallas equivalent of peft flora's ElementWiseMultiply (lang=None path)."""

    def __init__(self, size, rank, forward_type="alpha", fix_alpha=False,
                 dtype=jnp.float32,
                 block_budget_bytes=_DEFAULT_BLOCK_BUDGET_BYTES):
        size = tuple(size)
        assert len(size) == 2, "only (num_heads, dim) weights supported"
        if rank > 1:
            self.weight = jnp.ones((rank,) + size, dtype)
        else:
            self.weight = jnp.ones(size, dtype)
        self.forward_type = forward_type
        self.num_heads = size[0]
        self.dim = size[-1]
        self.rank = rank
        self.fix_alpha = fix_alpha
        self.block_budget_bytes = block_budget_bytes

    def randomize(self, key):
        self.weight = jax.random.uniform(key, self.weight.shape, self.weight.dtype)

    def __call__(self, x, lang=None):
        # TODO(synk): lang-indexed selection (torch.index_select) path not implemented.
        assert lang is None
        if self.forward_type == "alpha":
            examples_per_model = x.shape[0] // self.weight.shape[-2]
            # TODO(synk): examples_per_model == 0 fallback branch not implemented.
            assert examples_per_model > 0 and x.shape[0] % self.num_heads == 0
            if self.rank > 1:
                return _alpha_rank_gt1(x, self.weight, self.num_heads,
                                       self.block_budget_bytes)
            return _alpha_like_rank1(x, self.weight, self.num_heads,
                                     self.block_budget_bytes)
        elif self.forward_type == "gamma":
            examples_per_model = x.shape[0] // self.rank // self.weight.shape[-2]
            assert examples_per_model > 0
            if self.rank > 1:
                return _gamma_rank_gt1(x, self.weight, self.num_heads,
                                       self.block_budget_bytes)
            assert x.shape[0] % self.num_heads == 0
            return _alpha_like_rank1(x, self.weight, self.num_heads,
                                     self.block_budget_bytes)
        raise ValueError(self.forward_type)


# ---------------------------------------------------------------------------
# Pure-JAX reference (mirrors the PyTorch forward, lang=None)
# ---------------------------------------------------------------------------
def ref_forward(x, w, rank, forward_type, num_heads):
    if forward_type == "alpha":
        e = x.shape[0] // num_heads
        if rank > 1:
            alpha = jnp.tile(w, (1, e, 1))                 # (rank, B, D)
            res = x[None] * alpha[:, :, None, :]           # (rank, B, S, D)
            return res.reshape((-1,) + res.shape[2:])
        alpha = jnp.tile(w, (e, 1))
        return x * alpha[:, None, :]
    else:
        e = x.shape[0] // rank // num_heads
        if rank > 1:
            gamma = jnp.tile(w, (1, e, 1))                 # (rank, B/rank, D)
            xr = x.reshape((rank, -1) + x.shape[-2:])
            return jnp.mean(gamma[:, :, None, :] * xr, axis=0)
        gamma = jnp.tile(w, (e, 1))
        return gamma[:, None, :] * x


# ---------------------------------------------------------------------------
if __name__ == "__main__":
    key = jax.random.PRNGKey(0)
    case_keys = jax.random.split(key, 2)

    num_heads, dim, rank, examples_per_model = 2, 128, 3, 2

    def check(out, ref):
        assert out.shape == ref.shape, (out.shape, ref.shape)
        assert jnp.allclose(out, ref, atol=1e-5, rtol=1e-5)

    # case 0: default budget (single big block); case 1: tiny budget forces a
    # multi-step grid with seq tiling (exercises the pipelined path).
    for case, (seq, budget) in enumerate([(8, _DEFAULT_BLOCK_BUDGET_BYTES),
                                          (16, 8 * 1024)]):
        kws = jax.random.split(case_keys[case], 6)

        # --- alpha, rank > 1 ---
        m_a = ElementWiseMultiply((num_heads, dim), rank, forward_type="alpha",
                                  block_budget_bytes=budget)
        m_a.randomize(kws[0])
        x_a = jax.random.normal(kws[1],
                                (examples_per_model * num_heads, seq, dim),
                                jnp.float32)
        check(jax.block_until_ready(m_a(x_a)),
              ref_forward(x_a, m_a.weight, rank, "alpha", num_heads))

        # --- alpha, rank == 1 ---
        m_a1 = ElementWiseMultiply((num_heads, dim), 1, forward_type="alpha",
                                   block_budget_bytes=budget)
        m_a1.randomize(kws[2])
        x_a1 = jax.random.normal(kws[3],
                                 (examples_per_model * num_heads, seq, dim),
                                 jnp.float32)
        check(jax.block_until_ready(m_a1(x_a1)),
              ref_forward(x_a1, m_a1.weight, 1, "alpha", num_heads))

        # --- gamma, rank > 1 (mean over rank) ---
        m_g = ElementWiseMultiply((num_heads, dim), rank, forward_type="gamma",
                                  block_budget_bytes=budget)
        m_g.randomize(kws[4])
        x_g = jax.random.normal(kws[5],
                                (rank * examples_per_model * num_heads, seq, dim),
                                jnp.float32)
        check(jax.block_until_ready(m_g(x_g)),
              ref_forward(x_g, m_g.weight, rank, "gamma", num_heads))

    print("KERNEL_OK")
</pallas_src>

<mosaic_0001>
module attributes {stable_mosaic.version = 11 : i64} {
  func.func @_alpha_rank_gt1_kernel(%arg0: i32, %arg1: i32, %arg2: i32, %arg3: memref<2x2x8x128xf32, #tpu.memory_space<vmem>>, %arg4: memref<3x2x1x128xf32, #tpu.memory_space<vmem>>, %arg5: memref<1x2x2x8x128xf32, #tpu.memory_space<vmem>>) attributes {dimension_semantics = [#tpu.dimension_semantics<parallel>, #tpu.dimension_semantics<parallel>, #tpu.dimension_semantics<arbitrary>], iteration_bounds = array<i64: 1, 1, 3>, scalar_prefetch = 0 : i64, scratch_operands = 0 : i64, tpu.core_type = #tpu.core_type<tc>, window_params = [{transform_indices = @transform_0, window_bounds = array<i64: 2, 2, 8, 128>}, {pipeline_mode = #tpu.pipeline_mode<synchronous>, transform_indices = @transform_1, window_bounds = array<i64: 3, 2, 1, 128>}, {transform_indices = @transform_2, window_bounds = array<i64: 1, 2, 2, 8, 128>}]} {
    %c0 = arith.constant 0 : index
    %c0_0 = arith.constant 0 : index
    %c0_1 = arith.constant 0 : index
    %c0_2 = arith.constant 0 : index
    %0 = vector.load %arg3[%c0, %c0_0, %c0_1, %c0_2] : memref<2x2x8x128xf32, #tpu.memory_space<vmem>>, vector<2x2x8x128xf32>
    %1 = arith.index_cast %arg2 : i32 to index
    %c0_3 = arith.constant 0 : index
    %c0_4 = arith.constant 0 : index
    %c0_5 = arith.constant 0 : index
    %2 = vector.load %arg4[%1, %c0_3, %c0_4, %c0_5] : memref<3x2x1x128xf32, #tpu.memory_space<vmem>>, vector<1x2x1x128xf32>
    %3 = vector.broadcast %2 : vector<1x2x1x128xf32> to vector<2x2x8x128xf32>
    %4 = arith.mulf %0, %3 : vector<2x2x8x128xf32>
    %c0_6 = arith.constant 0 : index
    %c0_7 = arith.constant 0 : index
    %c0_8 = arith.constant 0 : index
    %c0_9 = arith.constant 0 : index
    %c0_10 = arith.constant 0 : index
    %5 = vector.load %arg5[%c0_6, %c0_7, %c0_8, %c0_9, %c0_10] : memref<1x2x2x8x128xf32, #tpu.memory_space<vmem>>, vector<1x2x2x8x128xf32>
    %6 = vector.shape_cast %5 : vector<1x2x2x8x128xf32> to vector<2x2x8x128xf32>
    %7 = vector.shape_cast %4 : vector<2x2x8x128xf32> to vector<1x2x2x8x128xf32>
    tpu.vector_store %arg5[%c0_6, %c0_7, %c0_8, %c0_9, %c0_10], %7 {strides = array<i32>} : memref<1x2x2x8x128xf32, #tpu.memory_space<vmem>>, vector<1x2x2x8x128xf32>,
    return
  }
  func.func @transform_0(%arg0: i32, %arg1: i32, %arg2: i32) -> (i32, i32, i32, i32) {
    %c0_i32 = arith.constant 0 : i32
    %c0_i32_0 = arith.constant 0 : i32
    %c0_i32_1 = arith.constant 0 : i32
    return %arg0, %c0_i32, %arg1, %c0_i32_0 : i32, i32, i32, i32
  }
  func.func @transform_1(%arg0: i32, %arg1: i32, %arg2: i32) -> (i32, i32, i32, i32) {
    %c0_i32 = arith.constant 0 : i32
    %c0_i32_0 = arith.constant 0 : i32
    %c0_i32_1 = arith.constant 0 : i32
    %c0_i32_2 = arith.constant 0 : i32
    %c0_i32_3 = arith.constant 0 : i32
    return %c0_i32, %c0_i32_0, %c0_i32_1, %c0_i32_2 : i32, i32, i32, i32
  }
  func.func @transform_2(%arg0: i32, %arg1: i32, %arg2: i32) -> (i32, i32, i32, i32, i32) {
    %c0_i32 = arith.constant 0 : i32
    %c0_i32_0 = arith.constant 0 : i32
    %c0_i32_1 = arith.constant 0 : i32
    return %arg2, %arg0, %c0_i32, %arg1, %c0_i32_0 : i32, i32, i32, i32, i32
  }
}

</mosaic_0001>

<bundles_post_ra>
// kernel: tpu_custom_call.1
= control target key start
LH: loop header
LB: loop body
LE: loop exit
PB: predicated region body
PF: predicated region fallthrough
CT: control target
= control target key end

     0   :  { %7 = vsyncpa [#allocation3], 0  ;;  %s782_s0 = inlined_call_operand.hbm [shape: f32[2,2,8,128], index: 0, kind: input, shape index: {}]   ;;  %s783_s1 = inlined_call_operand.hbm [shape: f32[3,2,1,128], index: 1, kind: input, shape index: {}]   ;;  %s784_s2 = inlined_call_operand.hbm [shape: f32[3,2,2,8,128], index: 2, kind: output, shape index: {}]  }
   0x1   :  { %8 = vsyncpa [#allocation6], 0 }
   0x2   :  { %9 = vsyncpa [#allocation4], 0 }
   0x3   :  { %11 = vsyncpa [#allocation4 + $0x1], 0  ;;  %s596_s9 = smov 0   ;;  %s598_s10 = smov 0  }
   0x4   :  { %s600_s11 = smov 0   ;;  %s602_s12 = smov 0  }
   0x5   :  { %s604_s13 = smov 0   ;;  %s606_s14 = smov 0  }
   0x6 LB: > { %s328_s15 = sadd.s32 4294967295, %s570_s14   ;;  %s329_s16 = sadd.s32 4294967294, %s570_s14   ;;  %s570_s14 = sphi %s606_s14, %s17_s14   ;;  %s566_s13 = sphi %s604_s13, %s802_s13   ;;  %s562_s12 = sphi %s602_s12, %s801_s12   ;;  %s558_s11 = sphi %s600_s11, %s800_s11   ;;  %s554_s10 = sphi %s598_s10, %s799_s10   ;;  %s550_s9 = sphi %s596_s9, %s798_s9  }
   0x7   : > { %s29_s17 = sadd.s32 1, %s566_s13  ;;  %s96_s18 = sadd.s32 1, %s558_s11 }
   0x8   : > { %p30_p0 = scmp.ge.s32.totalorder %s29_s17, 3  ;;  %p106_p1 = scmp.ne.s32.totalorder %s558_s11, %s554_s10 }
   0x9   : > { %p107_p2 = scmp.eq.s32.totalorder %s328_s15, 2  ;;  %p112_p3 = scmp.ne.s32.totalorder %s554_s10, %s550_s9 }
   0xa   : > { %s804_s17 = smov (%p30_p0, %s29_s17), 0  ;;  %p113_p5 = scmp.eq.s32.totalorder %s329_s16, 2 }
   0xb   : > { %p636_p4 = por %p107_p2, %p106_p1  ;;  %s89_s20 = ssub.s32 %s566_s13, %s804_s17 }
   0xc   : > { %p330_p6 = scmp.ge.s32.totalorder %s570_s14, 1  ;;  %p94_p7 = scmp.eq.s32.totalorder %s89_s20, 0 }
   0xd   : > { %s789_s19 = scalar_select %p636_p4, 1, 0 }
   0xe   : > { %p643_p8 = por %p113_p5, %p112_p3  ;;  %p120_p9 = scmp.lt.s32.totalorder %s570_s14, 4 }
   0xf   : > { %s649_s22 = scalar_select %p94_p7, %s558_s11, %s96_s18  }
  0x10   : > { %s790_s21 = scalar_select %p643_p8, 1, 0 }
  0x11   : > { %p651_p10 = pnand %p330_p6, %p120_p9  ;;  %p655_p11 = scmp.eq.s32.totalorder %s328_s15, 0 }
  0x12   : > { %s572_s25 = smov [#allocation2]   ;;  %s573_s28 = smov [#allocation5]  }
  0x13   : > { %s791_s23 = scalar_select %p651_p10, 1, 0 }
  0x14   : > { %s792_s24 = scalar_select %p655_p11, 1, 0 }
  0x15   : > { %p356_p12 = pneg %p651_p10  ;;  %s137_s26 = sshll.u32 %s572_s25, 4  ;;  %s138_s26 = int_to_ptr.vmem [resolvable:$true] %s137_s26 }
  0x16   : > { %s150_s29 = sshll.u32 %s573_s28, 4  ;;  %s428_s4 = scalar_lea.hbm %s782_s0, 512  ;;  %s667_s29 = int_to_ptr.vmem [resolvable:$true] %s150_s29 }
  0x17   : > { %p663_p13 = pnand %p655_p11, %p356_p12  ;;  %p429_p0 = scmp.ne.s32.totalorder %s782_s0, %s428_s4 }
  0x18   : > { %p435_p5 = scmp.lt.u32.totalorder %s428_s4, %s782_s0 }
  0x19   : > { %p430_p1 = pneg %p663_p13 }
  0x1b   : > { %p431_p2 = pnand %p430_p1, %p429_p0 }
  0x1d   : > { %p432_p3 = pneg %p431_p2 }
  0x1f   : > { %p437_p6 = pnand %p435_p5, %p432_p3 }
  0x21   : > { %440 = shalt.err (!%p437_p6)
}
  0x22   : > { %s441_s15 = scalar_lea.vmem %s138_s26, 512  ;;  %p449_p8 = scmp.lt.s32.totalorder %s138_s26, %s138_s26 }
  0x23   : > { %p442_p7 = scmp.ne.s32.totalorder %s138_s26, %s441_s15  ;;  %p450_p4 = scmp.lt.s32.totalorder %s441_s15, %s441_s15 }
  0x25   : > { %p444_p9 = pnand %p442_p7, %p430_p1  ;;  %p451_p11 = por %p450_p4, %p449_p8 }
  0x27   : > { %p445_p12 = pneg %p444_p9 }
  0x29   : > { %p452_p10 = pnand %p451_p11, %p445_p12 }
  0x2b   : > { %455 = shalt.err (!%p452_p10)
}
  0x2c   : > { %s574_s16 = smov 128   ;;  %s575_s18 = smov 8  }
  0x2d   : > { %359 = dma.hbm_to_vmem [thread:$0]  (!%p663_p13), %s782_s0, 512, %s138_s26, [#allocation3], %s574_s16, %s574_s16, %s575_s18  }
  0x2e   : > { %s456_s3 = scalar_lea.hbm %s783_s1, 96 }
  0x2f   : > { %p457_p0 = scmp.ne.s32.totalorder %s783_s1, %s456_s3  ;;  %p463_p10 = scmp.lt.u32.totalorder %s456_s3, %s783_s1 }
  0x31   : > { %p459_p4 = pnand %p457_p0, %p430_p1 }
  0x33   : > { %p460_p8 = pneg %p459_p4 }
  0x35   : > { %p465_p11 = pnand %p463_p10, %p460_p8 }
  0x37   : > { %468 = shalt.err (!%p465_p11)
}
  0x38   : > { %s469_s26 = scalar_lea.vmem %s667_s29, 96  ;;  %p477_p6 = scmp.lt.s32.totalorder %s667_s29, %s667_s29 }
  0x39   : > { %p470_p2 = scmp.ne.s32.totalorder %s667_s29, %s469_s26  ;;  %p478_p7 = scmp.lt.s32.totalorder %s469_s26, %s469_s26 }
  0x3b   : > { %p472_p3 = pnand %p470_p2, %p430_p1  ;;  %p479_p9 = por %p478_p7, %p477_p6 }
  0x3d   : > { %p473_p5 = pneg %p472_p3 }
  0x3f   : > { %p480_p12 = pnand %p479_p9, %p473_p5 }
  0x41   : > { %483 = shalt.err (!%p480_p12)
}
  0x42   : > { %s576_s8 = smov 16   ;;  %s577_s15 = smov 1  }
  0x43   : > { %362 = dma.hbm_to_vmem [thread:$0]  (!%p663_p13), %s783_s1, 96, %s667_s29, [#allocation6], %s576_s8, %s576_s8, %s577_s15  }
  0x44   : > { %p794_p0 = scmp.ne.s32.totalorder %s791_s23, 0 }
  0x45   : > { %p795_p1 = scmp.ne.s32.totalorder (!%p794_p0), %s792_s24, 0 }
  0x46   : > { %166 = sbr.rel (%p794_p0) target bundleno = 109 (0x6d), region = 28 }
  0x4d   : > { %537 = dma.done.wait (%p795_p1), [#allocation3], 512  }
  0x4e   : > { %539 = vsyncadd (%p795_p1), [#allocation3], 4294966784 }
  0x4f   : > { %541 = dma.done.wait (%p795_p1), [#allocation6], 96  }
  0x50   : > { %543 = vsyncadd (%p795_p1), [#allocation6], 4294967200  ;;  %s184_s27 = sand.u32 1, %s554_s10   ;;  %s337_s20 = sshll.u32 %s562_s12, 1  ;;  %v189_v0 = vld [vmem:[#allocation2] sm:$0xff]  ;;  %v190_v2 = vld [vmem:[#allocation2 + $0x8] sm:$0xff] }
  0x51   : > { %s336_s29 = sshll.u32 %s184_s27, 5  ;;  %s345_s28 = sshll.u32 %s562_s12, 9  ;;  %v191_v5 = vld [vmem:[#allocation2 + $0x10] sm:$0xff]  ;;  %v192_v6 = vld [vmem:[#allocation2 + $0x18] sm:$0xff] }
  0x52   : > { %s186_s23 = scalar_lea.vmem [#allocation7], %s336_s29  ;;  %s194_s30 = scalar_lea.vmem [#allocation5], %s337_s20 }
  0x53   : > { %s235_s25 = sshll.u32 %s186_s23, 4  ;;  %v338_v1 = vld [vmem:[%s194_s30] ss:$0 sm:$0xff]  ;;  %v339_v4 = vld [vmem:[%s194_s30 + $0x1] ss:$0 sm:$0xff]  ;;  %s734_s4 = scalar_lea.hbm %s784_s2, %s345_s28  ;;  %s729_s25 = int_to_ptr.vmem [resolvable:$true] %s235_s25 }
  0x54   : > { %v209_v3 = vmul.f32 %v338_v1, %v189_v0  ;;  %v210_v7 = vmul.f32 %v339_v4, %v190_v2  ;;  %v211_v8 = vmul.f32 %v338_v1, %v191_v5  ;;  %v212_v9 = vmul.f32 %v339_v4, %v192_v6  ;;  %s736_s12 = scalar_lea.sflag [#allocation4], %s184_s27  ;;  %s484_s5 = scalar_lea.vmem %s729_s25, 512 }
  0x55   : > { %p485_p13 = scmp.ne.s32.totalorder %s729_s25, %s484_s5  ;;  %p796_p4 = scmp.ne.s32.totalorder %s789_s19, 0 }
  0x56   : > { %213 = vst [vmem:[%s186_s23] sm:$0xff] %v209_v3  ;;  %214 = vst [vmem:[%s186_s23 + $0x8] sm:$0xff] %v210_v7  ;;  %s578_s6 = smov [#allocation7]  }
  0x57   : > { %215 = vst [vmem:[%s186_s23 + $0x10] sm:$0xff] %v211_v8  ;;  %216 = vst [vmem:[%s186_s23 + $0x18] sm:$0xff] %v212_v9  ;;  %p486_p8 = pnand %p485_p13, %p796_p4  ;;  %s488_s7 = sshll.u32 %s578_s6, 4  ;;  %s489_s7 = int_to_ptr.vmem [resolvable:$false] %s488_s7 }
  0x58   : > { %s490_s26 = scalar_lea.vmem %s489_s7, 1024  ;;  %p491_p11 = scmp.lt.s32.totalorder %s729_s25, %s489_s7 }
  0x59   : > { %p487_p10 = pneg %p486_p8  ;;  %p492_p2 = scmp.lt.s32.totalorder %s490_s26, %s484_s5 }
  0x5b   : > { %p493_p3 = por %p492_p2, %p491_p11 }
  0x5d   : > { %p494_p5 = pnand %p493_p3, %p487_p10 }
  0x5f   : > { %497 = shalt.err (!%p494_p5)
}
  0x60   : > { %s498_s8 = scalar_lea.hbm %s734_s4, 512  ;;  %s502_s18 = scalar_lea.hbm %s784_s2, 1536 }
  0x61   : > { %p499_p6 = scmp.ne.s32.totalorder %s734_s4, %s498_s8  ;;  %p503_p12 = scmp.lt.u32.totalorder %s734_s4, %s784_s2 }
  0x62   : > { %p504_p0 = scmp.lt.u32.totalorder %s502_s18, %s498_s8  ;;  %p506_p13 = scmp.lt.u32.totalorder %s498_s8, %s734_s4 }
  0x63   : > { %p500_p7 = pnand %p499_p6, %p796_p4 }
  0x64   : > { %p505_p1 = por %p504_p0, %p503_p12 }
  0x65   : > { %p501_p9 = pneg %p500_p7 }
  0x66   : > { %p507_p8 = por %p506_p13, %p505_p1 }
  0x68   : > { %p508_p10 = pnand %p507_p8, %p501_p9 }
  0x6a   : > { %511 = shalt.err (!%p508_p10)
}
  0x6b   : > { %s579_s20 = smov 128   ;;  %s580_s23 = smov 8  }
  0x6c   : > { %354 = dma.vmem_to_hbm [thread:$0]  (%p796_p4), %s729_s25, 512, %s734_s4, %s736_s12, %s579_s20, %s579_s20, %s580_s23  }
  0x6d PF: > { %p371_p11 = scmp.ge.s32.totalorder %s570_s14, 2  ;;  %s250_s28 = sand.u32 1, %s550_s9  }
  0x6e   : > { %p797_p2 = scmp.ne.s32.totalorder %s790_s21, 0  ;;  %s251_s30 = scalar_lea.sflag [#allocation4], %s250_s28 }
  0x70   : > { %p364_p3 = pnand %p371_p11, %p797_p2 }
  0x72   : > { %545 = dma.done.wait (!%p364_p3), %s251_s30, 512  }
  0x73   : > { %547 = vsyncadd (!%p364_p3), %s251_s30, 4294966784  ;;  %s17_s14 = sadd.s32 1, %s570_s14   ;;  %s798_s9 = smov %s554_s10 }
  0x74   : > { %p14_p5 = scmp.ge.s32.totalorder %s17_s14, 5   ;;  %s799_s10 = smov %s558_s11 }
  0x75   : > { %s800_s11 = smov %s649_s22  ;;  %s801_s12 = smov %s566_s13 }
  0x76   : > { %s802_s13 = smov %s804_s17  ;;  %16 = sbr.rel (!%p14_p5) target bundleno = 6 (0x6), region = 71 }
  0x7d   :  { %256 = vsyncpa [#allocation3], 1 }
  0x7e   :  { %258 = vsyncpa [#allocation3 + $0x1], 1 }
  0x7f   :  { %259 = vsyncpa [#allocation6], 1 }
  0x80   :  { %260 = vsyncpa [#allocation4], 1 }
  0x81   :  { %262 = vsyncpa [#allocation4 + $0x1], 1 }

</bundles_post_ra>
